<compile_context>
chip_gen: v7x
topology: tpu7x:2x2x1
jax: 0.10.0
libtpu: 0.0.40
codegen_flags: <defaults>
</compile_context>

<pallas_src>
import functools

import jax
import jax.numpy as jnp
from jax.experimental import pallas as pl
from jax.experimental.pallas import tpu as pltpu


LANE = 128


def _round_up(x, m):
    return ((x + m - 1) // m) * m


def _vmem_limit_bytes():
    """Generation-aware VMEM budget (leave ~25% headroom for compiler scratch)."""
    cap = 64 * 1024 * 1024  # conservative default (v7x: 64 MiB / TC)
    try:
        info_fn = getattr(pltpu, "get_tpu_info", None)
        if info_fn is not None:
            cap = int(getattr(info_fn(), "vmem_capacity_bytes", cap))
    except Exception:
        pass
    return min((cap * 3) // 4, 112 * 1024 * 1024)


def _choose_row_tiling(n, preferred_tm=512):
    """Row tile tm and padded node count Npad (multiple of tm, row grid >= 2)."""
    npad = _round_up(n, LANE)
    tm = min(preferred_tm, max(LANE, _round_up((npad + 1) // 2, LANE)))
    npad = max(_round_up(npad, tm), 2 * tm)
    return npad, tm


def _agg_vmem_bytes(tm, tk, fin_pad, fout_pad, fused, full_panel):
    """Rough VMEM estimate for the aggregation kernels (double-buffered inputs)."""
    b = 2 * tm * tk * 2                      # A tile, bf16
    if fused:
        b += 2 * tk * fin_pad * 2            # H panel, bf16
        b += 2 * fin_pad * fout_pad * 2      # W, bf16
        acc = tm * fin_pad * 4
    else:
        b += 2 * tk * fout_pad * 2           # X (= H @ W) panel, bf16
        acc = tm * fout_pad * 4
    if not full_panel:
        b += acc                             # f32 accumulator scratch
    b += 2 * 8 * fout_pad * 4                # bias (sublane-padded)
    b += 2 * tm * fout_pad * 4               # output tile (f32 worst case)
    return b


def _pick_contraction_tile(npad, tm, fin_pad, fout_pad, vmem_limit, fused):
    """Prefer the whole contraction as one resident panel; else largest fitting tk."""
    if _agg_vmem_bytes(tm, npad, fin_pad, fout_pad, fused, True) <= vmem_limit:
        return npad
    cap = min(2048, npad)
    for tk in range(cap, LANE - 1, -LANE):
        if npad % tk == 0 and _agg_vmem_bytes(
                tm, tk, fin_pad, fout_pad, fused, False) <= vmem_limit:
            return tk
    return LANE


# ------------------------------ Pallas kernels ------------------------------

def _linear_kernel(h_ref, w_ref, out_ref):
    """out = H @ W  (row tile; bf16 MXU inputs, f32 accumulation, bf16 out)."""
    out_ref[...] = jnp.dot(
        h_ref[...], w_ref[...], preferred_element_type=jnp.float32
    ).astype(out_ref.dtype)


def _agg_full_kernel(a_ref, x_ref, b_ref, out_ref, *, apply_relu):
    """out = act(A_tile @ X + b); full contraction in one panel (no k grid)."""
    y = jnp.dot(a_ref[...], x_ref[...], preferred_element_type=jnp.float32)
    y = y + b_ref[...]
    if apply_relu:
        y = jnp.maximum(y, 0.0)
    out_ref[...] = y.astype(out_ref.dtype)


def _agg_xform_full_kernel(a_ref, h_ref, w_ref, b_ref, out_ref, *, apply_relu):
    """out = act((A_tile @ H) @ W + b); full contraction, fused transform."""
    ah = jnp.dot(a_ref[...], h_ref[...], preferred_element_type=jnp.float32)
    y = jnp.dot(ah.astype(jnp.bfloat16), w_ref[...],
                preferred_element_type=jnp.float32)
    y = y + b_ref[...]
    if apply_relu:
        y = jnp.maximum(y, 0.0)
    out_ref[...] = y.astype(out_ref.dtype)


def _agg_kernel(a_ref, x_ref, b_ref, out_ref, acc_ref, *, apply_relu):
    """out = act(A @ X + b); N-contraction accumulates over grid axis 1."""
    k = pl.program_id(1)

    @pl.when(k == 0)
    def _():
        acc_ref[...] = jnp.zeros_like(acc_ref)

    acc_ref[...] += jnp.dot(a_ref[...], x_ref[...],
                            preferred_element_type=jnp.float32)

    @pl.when(k == pl.num_programs(1) - 1)
    def _():
        y = acc_ref[...] + b_ref[...]
        if apply_relu:
            y = jnp.maximum(y, 0.0)
        out_ref[...] = y.astype(out_ref.dtype)


def _agg_xform_kernel(a_ref, h_ref, w_ref, b_ref, out_ref, acc_ref, *, apply_relu):
    """out = act((A @ H) @ W + b); contraction runs at width Fin (Fin <= Fout)."""
    k = pl.program_id(1)

    @pl.when(k == 0)
    def _():
        acc_ref[...] = jnp.zeros_like(acc_ref)

    acc_ref[...] += jnp.dot(a_ref[...], h_ref[...],
                            preferred_element_type=jnp.float32)

    @pl.when(k == pl.num_programs(1) - 1)
    def _():
        y = jnp.dot(acc_ref[...].astype(jnp.bfloat16), w_ref[...],
                    preferred_element_type=jnp.float32)
        y = y + b_ref[...]
        if apply_relu:
            y = jnp.maximum(y, 0.0)
        out_ref[...] = y.astype(out_ref.dtype)


# ----------------------------- pallas_call wrappers --------------------------

def _linear(h_bf16, w_bf16, tm, vmem_limit):
    npad, fin_pad = h_bf16.shape
    fout_pad = w_bf16.shape[1]
    return pl.pallas_call(
        _linear_kernel,
        out_shape=jax.ShapeDtypeStruct((npad, fout_pad), jnp.bfloat16),
        grid_spec=pltpu.PrefetchScalarGridSpec(
            num_scalar_prefetch=0,
            grid=(npad // tm,),
            in_specs=[
                pl.BlockSpec((tm, fin_pad), lambda i: (i, 0)),
                pl.BlockSpec((fin_pad, fout_pad), lambda i: (0, 0)),
            ],
            out_specs=pl.BlockSpec((tm, fout_pad), lambda i: (i, 0)),
        ),
        compiler_params=pltpu.CompilerParams(
            dimension_semantics=("parallel",),
            vmem_limit_bytes=vmem_limit,
        ),
    )(h_bf16, w_bf16)


def _aggregate(a_bf16, x_bf16, b_pad, *, tm, tk, apply_relu, out_dtype, vmem_limit):
    npad = a_bf16.shape[0]
    fout_pad = x_bf16.shape[1]

    if tk >= npad:
        # Full contraction panel: no k grid, no accumulator, one dot per row tile.
        return pl.pallas_call(
            functools.partial(_agg_full_kernel, apply_relu=apply_relu),
            out_shape=jax.ShapeDtypeStruct((npad, fout_pad), out_dtype),
            grid_spec=pltpu.PrefetchScalarGridSpec(
                num_scalar_prefetch=0,
                grid=(npad // tm,),
                in_specs=[
                    pl.BlockSpec((tm, npad), lambda i: (i, 0)),
                    pl.BlockSpec((npad, fout_pad), lambda i: (0, 0)),
                    pl.BlockSpec((1, fout_pad), lambda i: (0, 0)),
                ],
                out_specs=pl.BlockSpec((tm, fout_pad), lambda i: (i, 0)),
            ),
            compiler_params=pltpu.CompilerParams(
                dimension_semantics=("parallel",),
                vmem_limit_bytes=vmem_limit,
            ),
        )(a_bf16, x_bf16, b_pad)

    return pl.pallas_call(
        functools.partial(_agg_kernel, apply_relu=apply_relu),
        out_shape=jax.ShapeDtypeStruct((npad, fout_pad), out_dtype),
        grid_spec=pltpu.PrefetchScalarGridSpec(
            num_scalar_prefetch=0,
            grid=(npad // tm, npad // tk),
            in_specs=[
                pl.BlockSpec((tm, tk), lambda i, k: (i, k)),
                pl.BlockSpec((tk, fout_pad), lambda i, k: (k, 0)),
                pl.BlockSpec((1, fout_pad), lambda i, k: (0, 0)),
            ],
            out_specs=pl.BlockSpec((tm, fout_pad), lambda i, k: (i, 0)),
            scratch_shapes=[pltpu.VMEM((tm, fout_pad), jnp.float32)],
        ),
        compiler_params=pltpu.CompilerParams(
            dimension_semantics=("parallel", "arbitrary"),
            vmem_limit_bytes=vmem_limit,
        ),
    )(a_bf16, x_bf16, b_pad)


def _aggregate_then_transform(a_bf16, h_bf16, w_bf16, b_pad, *, tm, tk,
                              apply_relu, out_dtype, vmem_limit):
    npad = a_bf16.shape[0]
    fin_pad = h_bf16.shape[1]
    fout_pad = w_bf16.shape[1]

    if tk >= npad:
        return pl.pallas_call(
            functools.partial(_agg_xform_full_kernel, apply_relu=apply_relu),
            out_shape=jax.ShapeDtypeStruct((npad, fout_pad), out_dtype),
            grid_spec=pltpu.PrefetchScalarGridSpec(
                num_scalar_prefetch=0,
                grid=(npad // tm,),
                in_specs=[
                    pl.BlockSpec((tm, npad), lambda i: (i, 0)),
                    pl.BlockSpec((npad, fin_pad), lambda i: (0, 0)),
                    pl.BlockSpec((fin_pad, fout_pad), lambda i: (0, 0)),
                    pl.BlockSpec((1, fout_pad), lambda i: (0, 0)),
                ],
                out_specs=pl.BlockSpec((tm, fout_pad), lambda i: (i, 0)),
            ),
            compiler_params=pltpu.CompilerParams(
                dimension_semantics=("parallel",),
                vmem_limit_bytes=vmem_limit,
            ),
        )(a_bf16, h_bf16, w_bf16, b_pad)

    return pl.pallas_call(
        functools.partial(_agg_xform_kernel, apply_relu=apply_relu),
        out_shape=jax.ShapeDtypeStruct((npad, fout_pad), out_dtype),
        grid_spec=pltpu.PrefetchScalarGridSpec(
            num_scalar_prefetch=0,
            grid=(npad // tm, npad // tk),
            in_specs=[
                pl.BlockSpec((tm, tk), lambda i, k: (i, k)),
                pl.BlockSpec((tk, fin_pad), lambda i, k: (k, 0)),
                pl.BlockSpec((fin_pad, fout_pad), lambda i, k: (0, 0)),
                pl.BlockSpec((1, fout_pad), lambda i, k: (0, 0)),
            ],
            out_specs=pl.BlockSpec((tm, fout_pad), lambda i, k: (i, 0)),
            scratch_shapes=[pltpu.VMEM((tm, fin_pad), jnp.float32)],
        ),
        compiler_params=pltpu.CompilerParams(
            dimension_semantics=("parallel", "arbitrary"),
            vmem_limit_bytes=vmem_limit,
        ),
    )(a_bf16, h_bf16, w_bf16, b_pad)


# ----------------------------- Layer / model ---------------------------------

def gcn_layer(a_bf16, h_bf16, w, b, *, f_in, f_out, apply_relu, tm, vmem_limit,
              out_dtype):
    """One GraphConv layer.  Inputs/outputs use zero-padded [Npad, Fpad] layout."""
    npad = a_bf16.shape[0]
    fin_pad = _round_up(f_in, LANE)
    fout_pad = _round_up(f_out, LANE)
    assert h_bf16.shape == (npad, fin_pad)

    w_bf16 = (jnp.zeros((fin_pad, fout_pad), jnp.bfloat16)
              .at[:f_in, :f_out].set(w.astype(jnp.bfloat16)))
    b_pad = jnp.zeros((1, fout_pad), jnp.float32).at[0, :f_out].set(b)

    if f_in > f_out:
        # DGL ordering: transform first (cheaper), then aggregate A @ (H W) + b.
        hw = _linear(h_bf16, w_bf16, tm, vmem_limit)        # [Npad, Fout_pad] bf16
        tk = _pick_contraction_tile(npad, tm, fin_pad, fout_pad, vmem_limit,
                                    fused=False)
        return _aggregate(a_bf16, hw, b_pad, tm=tm, tk=tk, apply_relu=apply_relu,
                          out_dtype=out_dtype, vmem_limit=vmem_limit)

    # Aggregate first at width Fin, then transform: (A H) W + b (fused kernel).
    tk = _pick_contraction_tile(npad, tm, fin_pad, fout_pad, vmem_limit, fused=True)
    return _aggregate_then_transform(a_bf16, h_bf16, w_bf16, b_pad, tm=tm, tk=tk,
                                     apply_relu=apply_relu, out_dtype=out_dtype,
                                     vmem_limit=vmem_limit)


def init_gcn_params(key, in_feats, n_hidden, n_classes, n_layers):
    """Deterministic kaiming-normal weights, zero biases (as reset_parameters)."""
    dims = []
    if n_layers == 1:
        dims.append((in_feats, n_classes))
    else:
        dims.append((in_feats, n_hidden))
        for _ in range(n_layers - 2):
            dims.append((n_hidden, n_hidden))
        dims.append((n_hidden, n_classes))
    params = []
    for (fi, fo) in dims:
        key, sub = jax.random.split(key)
        w = jax.random.normal(sub, (fi, fo), dtype=jnp.float32) * jnp.sqrt(2.0 / fi)
        b = jnp.zeros((fo,), dtype=jnp.float32)
        params.append((w, b))
    return params


@jax.jit
def gcn_forward(a_hat, features, params):
    """Reproduces GCN.forward (eval mode): returns (h, middle_feats)."""
    n, f_in0 = features.shape
    npad, tm = _choose_row_tiling(n)
    vmem_limit = _vmem_limit_bytes()

    # Pad the adjacency directly in bf16 (no N^2 f32 intermediate).
    a_bf16 = (jnp.zeros((npad, npad), jnp.bfloat16)
              .at[:n, :n].set(a_hat.astype(jnp.bfloat16)))

    fin = f_in0
    h = (jnp.zeros((npad, _round_up(fin, LANE)), jnp.bfloat16)
         .at[:n, :fin].set(features.astype(jnp.bfloat16)))

    middle_feats = [features]
    n_layers = len(params)
    for i, (w, b) in enumerate(params):
        f_out = w.shape[1]
        # Dropout between layers is identity in eval mode.
        apply_relu = (i < n_layers - 1) or (n_layers == 1)
        last = (i == n_layers - 1)
        out_dtype = jnp.float32 if last else jnp.bfloat16
        h = gcn_layer(a_bf16, h, w, b, f_in=fin, f_out=f_out,
                      apply_relu=apply_relu, tm=tm, vmem_limit=vmem_limit,
                      out_dtype=out_dtype)
        middle_feats.append(h[:n, :f_out])
        fin = f_out
    return middle_feats[-1], middle_feats


def build_normalized_adjacency(n):
    """Deterministic ring graph, DGL norm='both':  A_hat = D^-1/2 A D^-1/2."""
    idx = jnp.arange(n)
    a = jnp.zeros((n, n), dtype=jnp.float32)
    a = a.at[idx, (idx + 1) % n].set(1.0)
    a = a.at[idx, (idx - 1) % n].set(1.0)
    deg = a.sum(axis=1)
    d_inv_sqrt = jnp.where(deg > 0, 1.0 / jnp.sqrt(jnp.maximum(deg, 1e-12)), 0.0)
    return d_inv_sqrt[:, None] * a * d_inv_sqrt[None, :]


# --------------------------------- main ---------------------------------------

if __name__ == "__main__":
    N = 16          # nodes
    IN_FEATS = 8
    N_HIDDEN = 32
    N_CLASSES = 4
    N_LAYERS = 2    # -> GraphConv(8->32, relu), GraphConv(32->4)

    key = jax.random.PRNGKey(0)
    kf, kp = jax.random.split(key)

    features = jax.random.normal(kf, (N, IN_FEATS), dtype=jnp.float32)
    a_hat = build_normalized_adjacency(N)
    params = init_gcn_params(kp, IN_FEATS, N_HIDDEN, N_CLASSES, N_LAYERS)

    h, middle_feats = gcn_forward(a_hat, features, params)
    jax.block_until_ready(h)
    for mf in middle_feats:
        jax.block_until_ready(mf)

    # Sanity check vs. a pure-JAX f32 reference (loose tol: kernel uses bf16 MXU inputs)
    h_ref = features
    for i, (w, b) in enumerate(params):
        y = a_hat @ (h_ref @ w) + b
        if i < len(params) - 1 or len(params) == 1:
            y = jnp.maximum(y, 0.0)
        h_ref = y

    assert h.shape == (N, N_CLASSES)
    assert len(middle_feats) == N_LAYERS + 1
    assert jnp.allclose(h.astype(jnp.float32), h_ref, rtol=5e-2, atol=5e-2), \
        float(jnp.max(jnp.abs(h.astype(jnp.float32) - h_ref)))
    print("KERNEL_OK")
</pallas_src>

<mosaic_0001>
module attributes {stable_mosaic.version = 11 : i64} {
  func.func @_agg_xform_full_kernel(%arg0: i32, %arg1: memref<128x256xbf16, #tpu.memory_space<vmem>>, %arg2: memref<256x128xbf16, #tpu.memory_space<vmem>>, %arg3: memref<128x128xbf16, #tpu.memory_space<vmem>>, %arg4: memref<1x128xf32, #tpu.memory_space<vmem>>, %arg5: memref<128x128xbf16, #tpu.memory_space<vmem>>) attributes {dimension_semantics = [#tpu.dimension_semantics<parallel>], iteration_bounds = array<i64: 2>, scalar_prefetch = 0 : i64, scratch_operands = 0 : i64, tpu.core_type = #tpu.core_type<tc>, window_params = [{transform_indices = @transform_0, window_bounds = array<i64: 128, 256>}, {pipeline_mode = #tpu.pipeline_mode<synchronous>, transform_indices = @transform_1, window_bounds = array<i64: 256, 128>}, {pipeline_mode = #tpu.pipeline_mode<synchronous>, transform_indices = @transform_2, window_bounds = array<i64: 128, 128>}, {pipeline_mode = #tpu.pipeline_mode<synchronous>, transform_indices = @transform_3, window_bounds = array<i64: 1, 128>}, {transform_indices = @transform_4, window_bounds = array<i64: 128, 128>}]} {
    %c0 = arith.constant 0 : index
    %c0_0 = arith.constant 0 : index
    %0 = vector.load %arg1[%c0, %c0_0] : memref<128x256xbf16, #tpu.memory_space<vmem>>, vector<128x256xbf16>
    %c0_1 = arith.constant 0 : index
    %c0_2 = arith.constant 0 : index
    %1 = vector.load %arg2[%c0_1, %c0_2] : memref<256x128xbf16, #tpu.memory_space<vmem>>, vector<256x128xbf16>
    %cst = arith.constant dense<0.000000e+00> : vector<128x128xf32>
    %2 = tpu.matmul %0, %1, %cst {dimension_numbers = #tpu.dot_dimension_numbers<[1], [0], [0], [1], [0, 0, 1, 1], [], []>} : vector<128x256xbf16>, vector<256x128xbf16>, vector<128x128xf32> -> vector<128x128xf32>
    %3 = arith.truncf %2 : vector<128x128xf32> to vector<128x128xbf16>
    %c0_3 = arith.constant 0 : index
    %c0_4 = arith.constant 0 : index
    %4 = vector.load %arg3[%c0_3, %c0_4] : memref<128x128xbf16, #tpu.memory_space<vmem>>, vector<128x128xbf16>
    %cst_5 = arith.constant dense<0.000000e+00> : vector<128x128xf32>
    %5 = tpu.matmul %3, %4, %cst_5 {dimension_numbers = #tpu.dot_dimension_numbers<[1], [0], [0], [1], [0, 0, 1, 1], [], []>} : vector<128x128xbf16>, vector<128x128xbf16>, vector<128x128xf32> -> vector<128x128xf32>
    %c0_6 = arith.constant 0 : index
    %c0_7 = arith.constant 0 : index
    %6 = vector.load %arg4[%c0_6, %c0_7] : memref<1x128xf32, #tpu.memory_space<vmem>>, vector<1x128xf32>
    %7 = vector.broadcast %6 : vector<1x128xf32> to vector<128x128xf32>
    %8 = arith.addf %5, %7 : vector<128x128xf32>
    %cst_8 = arith.constant 0.000000e+00 : f32
    %9 = vector.broadcast %cst_8 : f32 to vector<128x128xf32>
    %10 = arith.maximumf %8, %9 : vector<128x128xf32>
    %11 = arith.truncf %10 : vector<128x128xf32> to vector<128x128xbf16>
    %c0_9 = arith.constant 0 : index
    %c0_10 = arith.constant 0 : index
    %12 = vector.load %arg5[%c0_9, %c0_10] : memref<128x128xbf16, #tpu.memory_space<vmem>>, vector<128x128xbf16>
    tpu.vector_store %arg5[%c0_9, %c0_10], %11 {strides = array<i32>} : memref<128x128xbf16, #tpu.memory_space<vmem>>, vector<128x128xbf16>,
    return
  }
  func.func @transform_0(%arg0: i32) -> (i32, i32) {
    %c0_i32 = arith.constant 0 : i32
    %c0_i32_0 = arith.constant 0 : i32
    return %arg0, %c0_i32 : i32, i32
  }
  func.func @transform_1(%arg0: i32) -> (i32, i32) {
    %c0_i32 = arith.constant 0 : i32
    %c0_i32_0 = arith.constant 0 : i32
    %c0_i32_1 = arith.constant 0 : i32
    return %c0_i32, %c0_i32_0 : i32, i32
  }
  func.func @transform_2(%arg0: i32) -> (i32, i32) {
    %c0_i32 = arith.constant 0 : i32
    %c0_i32_0 = arith.constant 0 : i32
    %c0_i32_1 = arith.constant 0 : i32
    return %c0_i32, %c0_i32_0 : i32, i32
  }
  func.func @transform_3(%arg0: i32) -> (i32, i32) {
    %c0_i32 = arith.constant 0 : i32
    %c0_i32_0 = arith.constant 0 : i32
    %c0_i32_1 = arith.constant 0 : i32
    return %c0_i32, %c0_i32_0 : i32, i32
  }
  func.func @transform_4(%arg0: i32) -> (i32, i32) {
    %c0_i32 = arith.constant 0 : i32
    %c0_i32_0 = arith.constant 0 : i32
    return %arg0, %c0_i32 : i32, i32
  }
}

module attributes {stable_mosaic.version = 11 : i64} {
  func.func @_agg_full_kernel(%arg0: i32, %arg1: memref<128x256xbf16, #tpu.memory_space<vmem>>, %arg2: memref<256x128xbf16, #tpu.memory_space<vmem>>, %arg3: memref<1x128xf32, #tpu.memory_space<vmem>>, %arg4: memref<128x128xf32, #tpu.memory_space<vmem>>) attributes {dimension_semantics = [#tpu.dimension_semantics<parallel>], iteration_bounds = array<i64: 2>, scalar_prefetch = 0 : i64, scratch_operands = 0 : i64, tpu.core_type = #tpu.core_type<tc>, window_params = [{transform_indices = @transform_0, window_bounds = array<i64: 128, 256>}, {pipeline_mode = #tpu.pipeline_mode<synchronous>, transform_indices = @transform_1, window_bounds = array<i64: 256, 128>}, {pipeline_mode = #tpu.pipeline_mode<synchronous>, transform_indices = @transform_2, window_bounds = array<i64: 1, 128>}, {transform_indices = @transform_3, window_bounds = array<i64: 128, 128>}]} {
    %c0 = arith.constant 0 : index
    %c0_0 = arith.constant 0 : index
    %0 = vector.load %arg1[%c0, %c0_0] : memref<128x256xbf16, #tpu.memory_space<vmem>>, vector<128x256xbf16>
    %c0_1 = arith.constant 0 : index
    %c0_2 = arith.constant 0 : index
    %1 = vector.load %arg2[%c0_1, %c0_2] : memref<256x128xbf16, #tpu.memory_space<vmem>>, vector<256x128xbf16>
    %cst = arith.constant dense<0.000000e+00> : vector<128x128xf32>
    %2 = tpu.matmul %0, %1, %cst {dimension_numbers = #tpu.dot_dimension_numbers<[1], [0], [0], [1], [0, 0, 1, 1], [], []>} : vector<128x256xbf16>, vector<256x128xbf16>, vector<128x128xf32> -> vector<128x128xf32>
    %c0_3 = arith.constant 0 : index
    %c0_4 = arith.constant 0 : index
    %3 = vector.load %arg3[%c0_3, %c0_4] : memref<1x128xf32, #tpu.memory_space<vmem>>, vector<1x128xf32>
    %4 = vector.broadcast %3 : vector<1x128xf32> to vector<128x128xf32>
    %5 = arith.addf %2, %4 : vector<128x128xf32>
    %c0_5 = arith.constant 0 : index
    %c0_6 = arith.constant 0 : index
    %6 = vector.load %arg4[%c0_5, %c0_6] : memref<128x128xf32, #tpu.memory_space<vmem>>, vector<128x128xf32>
    tpu.vector_store %arg4[%c0_5, %c0_6], %5 {strides = array<i32>} : memref<128x128xf32, #tpu.memory_space<vmem>>, vector<128x128xf32>,
    return
  }
  func.func @transform_0(%arg0: i32) -> (i32, i32) {
    %c0_i32 = arith.constant 0 : i32
    %c0_i32_0 = arith.constant 0 : i32
    return %arg0, %c0_i32 : i32, i32
  }
  func.func @transform_1(%arg0: i32) -> (i32, i32) {
    %c0_i32 = arith.constant 0 : i32
    %c0_i32_0 = arith.constant 0 : i32
    %c0_i32_1 = arith.constant 0 : i32
    return %c0_i32, %c0_i32_0 : i32, i32
  }
  func.func @transform_2(%arg0: i32) -> (i32, i32) {
    %c0_i32 = arith.constant 0 : i32
    %c0_i32_0 = arith.constant 0 : i32
    %c0_i32_1 = arith.constant 0 : i32
    return %c0_i32, %c0_i32_0 : i32, i32
  }
  func.func @transform_3(%arg0: i32) -> (i32, i32) {
    %c0_i32 = arith.constant 0 : i32
    %c0_i32_0 = arith.constant 0 : i32
    return %arg0, %c0_i32 : i32, i32
  }
}

module attributes {stable_mosaic.version = 11 : i64} {
  func.func @_linear_kernel(%arg0: i32, %arg1: memref<128x128xbf16, #tpu.memory_space<vmem>>, %arg2: memref<128x128xbf16, #tpu.memory_space<vmem>>, %arg3: memref<128x128xbf16, #tpu.memory_space<vmem>>) attributes {dimension_semantics = [#tpu.dimension_semantics<parallel>], iteration_bounds = array<i64: 2>, scalar_prefetch = 0 : i64, scratch_operands = 0 : i64, tpu.core_type = #tpu.core_type<tc>, window_params = [{transform_indices = @transform_0, window_bounds = array<i64: 128, 128>}, {pipeline_mode = #tpu.pipeline_mode<synchronous>, transform_indices = @transform_1, window_bounds = array<i64: 128, 128>}, {transform_indices = @transform_2, window_bounds = array<i64: 128, 128>}]} {
    %c0 = arith.constant 0 : index
    %c0_0 = arith.constant 0 : index
    %0 = vector.load %arg1[%c0, %c0_0] : memref<128x128xbf16, #tpu.memory_space<vmem>>, vector<128x128xbf16>
    %c0_1 = arith.constant 0 : index
    %c0_2 = arith.constant 0 : index
    %1 = vector.load %arg2[%c0_1, %c0_2] : memref<128x128xbf16, #tpu.memory_space<vmem>>, vector<128x128xbf16>
    %cst = arith.constant dense<0.000000e+00> : vector<128x128xf32>
    %2 = tpu.matmul %0, %1, %cst {dimension_numbers = #tpu.dot_dimension_numbers<[1], [0], [0], [1], [0, 0, 1, 1], [], []>} : vector<128x128xbf16>, vector<128x128xbf16>, vector<128x128xf32> -> vector<128x128xf32>
    %3 = arith.truncf %2 : vector<128x128xf32> to vector<128x128xbf16>
    %c0_3 = arith.constant 0 : index
    %c0_4 = arith.constant 0 : index
    %4 = vector.load %arg3[%c0_3, %c0_4] : memref<128x128xbf16, #tpu.memory_space<vmem>>, vector<128x128xbf16>
    tpu.vector_store %arg3[%c0_3, %c0_4], %3 {strides = array<i32>} : memref<128x128xbf16, #tpu.memory_space<vmem>>, vector<128x128xbf16>,
    return
  }
  func.func @transform_0(%arg0: i32) -> (i32, i32) {
    %c0_i32 = arith.constant 0 : i32
    %c0_i32_0 = arith.constant 0 : i32
    return %arg0, %c0_i32 : i32, i32
  }
  func.func @transform_1(%arg0: i32) -> (i32, i32) {
    %c0_i32 = arith.constant 0 : i32
    %c0_i32_0 = arith.constant 0 : i32
    %c0_i32_1 = arith.constant 0 : i32
    return %c0_i32, %c0_i32_0 : i32, i32
  }
  func.func @transform_2(%arg0: i32) -> (i32, i32) {
    %c0_i32 = arith.constant 0 : i32
    %c0_i32_0 = arith.constant 0 : i32
    return %arg0, %c0_i32 : i32, i32
  }
}

</mosaic_0001>

<bundles_post_ra>
// kernel: gcn_forward.5
= control target key start
LH: loop header
LB: loop body
LE: loop exit
PB: predicated region body
PF: predicated region fallthrough
CT: control target
= control target key end

     0   :  { %s780_s12 = smov 0   ;;  %s909_s0 = inlined_call_operand.vmem [shape: bf16[256,256], index: 0, kind: input, shape index: {}]   ;;  %s910_s1 = inlined_call_operand.vmem [shape: bf16[256,128], index: 1, kind: input, shape index: {}]   ;;  %s911_s2 = inlined_call_operand.vmem [shape: f32[1,128], index: 2, kind: input, shape index: {}]   ;;  %s912_s3 = inlined_call_operand.vmem [shape: f32[256,128], index: 3, kind: output, shape index: {}]  }
   0x1 LB: > { %s578_s13 = sadd.s32 4294967295, %s758_s12   ;;  %p582_p0 = scmp.ge.s32.totalorder %s758_s12, 1  ;;  %s758_s12 = sphi %s780_s12, %s13_s12  }
   0x2   : > { %p139_p1 = scmp.lt.s32.totalorder %s758_s12, 3 }
   0x4   : > { %p140_p2 = pnand %p582_p0, %p139_p1 }
   0x5   : > { %v712_v0 = vld [vmem:[%s910_s1 + $0x40] sm:$0xff] (!%p140_p2)   ;;  %s583_s16 = sshll.u32 (!%p140_p2), %s578_s13, 4  ;;  %v714_v2 = vld [vmem:[%s910_s1 + $0x48] sm:$0xff] (!%p140_p2)   ;;  %v716_v4 = vld [vmem:[%s910_s1 + $0x50] sm:$0xff] (!%p140_p2)  }
   0x6   : > { %143 = sbr.rel (%p140_p2) target bundleno = 282 (0x11a), region = 32  ;;  %v713_v1 = vld [vmem:[%s910_s1] sm:$0xff] (!%p140_p2)   ;;  %624 = vmatprep.subr.bf16.mxu0 (!%p140_p2), %v712_v0  ;;  %688 = vmatprep.subr.bf16.mxu1 (!%p140_p2), %v712_v0  ;;  %v715_v3 = vld [vmem:[%s910_s1 + $0x8] sm:$0xff] (!%p140_p2)   ;;  %p165_p3 = scmp.lt.s32.totalorder (!%p140_p2), %s583_s16, 31  ;;  %v717_v5 = vld [vmem:[%s910_s1 + $0x10] sm:$0xff] (!%p140_p2)  }
   0x7   : > { %625 = vmatpush3.bf16.msra.mxu0 (!%p140_p2), %v713_v1  ;;  %696 = vmatpush3.bf16.msra.mxu1 (!%p140_p2), %v713_v1  ;;  %v718_v6 = vld [vmem:[%s910_s1 + $0x58] sm:$0xff] (!%p140_p2)   ;;  %v720_v8 = vld [vmem:[%s910_s1 + $0x60] sm:$0xff] (!%p140_p2)   ;;  %v722_v10 = vld [vmem:[%s910_s1 + $0x68] sm:$0xff] (!%p140_p2)  }
   0x8   : > { %626 = vmatprep.subr.bf16.mxu0 (!%p140_p2), %v714_v2  ;;  %689 = vmatprep.subr.bf16.mxu1 (!%p140_p2), %v714_v2  ;;  %v719_v7 = vld [vmem:[%s910_s1 + $0x18] sm:$0xff] (!%p140_p2)   ;;  %v721_v9 = vld [vmem:[%s910_s1 + $0x20] sm:$0xff] (!%p140_p2)   ;;  %v723_v13 = vld [vmem:[%s910_s1 + $0x28] sm:$0xff] (!%p140_p2)  }
   0x9   : > { %v724_v14 = vld [vmem:[%s910_s1 + $0x70] sm:$0xff] (!%p140_p2)   ;;  %v726_v16 = vld [vmem:[%s910_s1 + $0x78] sm:$0xff] (!%p140_p2)   ;;  %v865_v34 = vld [vmem:[%s911_s2] ss:$0 sm:$0xff] (!%p140_p2) }
   0xa   : > { %v725_v15 = vld [vmem:[%s910_s1 + $0x30] sm:$0xff] (!%p140_p2)   ;;  %v727_v17 = vld [vmem:[%s910_s1 + $0x38] sm:$0xff] (!%p140_p2)  }
   0xb   : > { %627 = vmatpush3.bf16.msra.mxu0 (!%p140_p2), %v715_v3  ;;  %697 = vmatpush3.bf16.msra.mxu1 (!%p140_p2), %v715_v3 }
   0xc   : > { %628 = vmatprep.subr.bf16.mxu0 (!%p140_p2), %v716_v4  ;;  %690 = vmatprep.subr.bf16.mxu1 (!%p140_p2), %v716_v4 }
   0xd   : > { %s914_s16 = smov (!%p165_p3, %s583_s16), 31 }
   0xe   : > { %s623_s4 = sshll.u32 %s914_s16, 3 }
   0xf   : > { %629 = vmatpush3.bf16.msra.mxu0 %v717_v5  ;;  %698 = vmatpush3.bf16.msra.mxu1 %v717_v5  ;;  %s823_s9 = scalar_lea.vmem %s909_s0, %s623_s4  ;;  %s872_s30 = scalar_lea.vmem %s912_s3, %s623_s4 }
  0x10   : > { %630 = vmatprep.subr.bf16.mxu0 %v718_v6  ;;  %691 = vmatprep.subr.bf16.mxu1 %v718_v6  ;;  %v730_v11 = vld [vmem:[%s823_s9 + $0x4] ss:$8 sps:$4 sm:$0xff]   ;;  %v728_v18 = vld [vmem:[%s823_s9] ss:$8 sps:$4 sm:$0xff]   ;;  %v734_v20 = vld [vmem:[%s823_s9 + $0x14] ss:$8 sps:$4 sm:$0xff]  }
  0x11   : > { %v733_v12 = vld [vmem:[%s823_s9 + $0x44] ss:$8 sps:$4 sm:$0xff]   ;;  %441 = vmatprep.mubr.bf16.mxu0 %v730_v11  ;;  %v731_v19 = vld [vmem:[%s823_s9 + $0x40] ss:$8 sps:$4 sm:$0xff]   ;;  %v736_v21 = vld [vmem:[%s823_s9 + $0x54] ss:$8 sps:$4 sm:$0xff]  }
  0x12   : > { %473 = vmatprep.mubr.bf16.mxu1 %v733_v12  ;;  %v738_v22 = vld [vmem:[%s823_s9 + $0x10] ss:$8 sps:$4 sm:$0xff]   ;;  %v740_v24 = vld [vmem:[%s823_s9 + $0x24] ss:$8 sps:$4 sm:$0xff]   ;;  %v744_v26 = vld [vmem:[%s823_s9 + $0x20] ss:$8 sps:$4 sm:$0xff]  }
  0x13   : > { %631 = vmatpush3.bf16.msra.mxu0 %v719_v7  ;;  %699 = vmatpush3.bf16.msra.mxu1 %v719_v7  ;;  %v739_v23 = vld [vmem:[%s823_s9 + $0x50] ss:$8 sps:$4 sm:$0xff]   ;;  %v742_v25 = vld [vmem:[%s823_s9 + $0x64] ss:$8 sps:$4 sm:$0xff]   ;;  %v745_v27 = vld [vmem:[%s823_s9 + $0x60] ss:$8 sps:$4 sm:$0xff]  }
  0x14   : > { %632 = vmatprep.subr.bf16.mxu0 %v720_v8  ;;  %692 = vmatprep.subr.bf16.mxu1 %v720_v8  ;;  %v746_v28 = vld [vmem:[%s823_s9 + $0x34] ss:$8 sps:$4 sm:$0xff]   ;;  %v750_v30 = vld [vmem:[%s823_s9 + $0x30] ss:$8 sps:$4 sm:$0xff]  }
  0x15   : > { %v748_v29 = vld [vmem:[%s823_s9 + $0x74] ss:$8 sps:$4 sm:$0xff]   ;;  %v751_v31 = vld [vmem:[%s823_s9 + $0x70] ss:$8 sps:$4 sm:$0xff]  }
  0x17   : > { %633 = vmatpush3.bf16.msra.mxu0 %v721_v9  ;;  %700 = vmatpush3.bf16.msra.mxu1 %v721_v9 }
  0x18   : > { %634 = vmatprep.subr.bf16.mxu0 %v722_v10  ;;  %693 = vmatprep.subr.bf16.mxu1 %v722_v10 }
  0x1b   : > { %635 = vmatpush3.bf16.msra.mxu0 %v723_v13  ;;  %701 = vmatpush3.bf16.msra.mxu1 %v723_v13 }
  0x1c   : > { %636 = vmatprep.subr.bf16.mxu0 %v724_v14  ;;  %694 = vmatprep.subr.bf16.mxu1 %v724_v14 }
  0x1f   : > { %637 = vmatpush3.bf16.msra.mxu0 %v725_v15  ;;  %702 = vmatpush3.bf16.msra.mxu1 %v725_v15 }
  0x20   : > { %638 = vmatprep.subr.bf16.mxu0 %v726_v16  ;;  %695 = vmatprep.subr.bf16.mxu1 %v726_v16 }
  0x23   : > { %639 = vmatpush3.bf16.msra.mxu0 %v727_v17  ;;  %703 = vmatpush3.bf16.msra.mxu1 %v727_v17 }
  0x26   : > { %442 = vmatmul.mubr.bf16.vlgmr.msra.gmra.mrb[0].mxu0 %v728_v18  ;;  %474 = vmatmul.mubr.bf16.vlgmr.msra.gmra.mrb[0].mxu1 %v731_v19 }
  0x27   : > { %449 = vmatprep.mubr.bf16.mxu0 %v734_v20  ;;  %481 = vmatprep.mubr.bf16.mxu1 %v736_v21 }
  0x2e   : > { %450 = vmatmul.mubr.bf16.gmra.mrb[4].mxu0 %v738_v22  ;;  %482 = vmatmul.mubr.bf16.gmra.mrb[4].mxu1 %v739_v23 }
  0x2f   : > { %457 = vmatprep.mubr.bf16.mxu0 %v740_v24  ;;  %489 = vmatprep.mubr.bf16.mxu1 %v742_v25 }
  0x36   : > { %458 = vmatmul.mubr.bf16.gmra.mrb[8].mxu0 %v744_v26  ;;  %490 = vmatmul.mubr.bf16.gmra.mrb[8].mxu1 %v745_v27 }
  0x37   : > { %465 = vmatprep.mubr.bf16.mxu0 %v746_v28  ;;  %497 = vmatprep.mubr.bf16.mxu1 %v748_v29 }
  0x3e   : > { %466 = vmatmul.mubr.bf16.gmra.mrb[12].mxu0 %v750_v30  ;;  %498 = vmatmul.mubr.bf16.gmra.mrb[12].mxu1 %v751_v31 }
  0xf9   : > { %v640_v32 = vpop.f32.mrb[0].mxu0  ;;  %v664_v33 = vpop.f32.mrb[0].mxu1 }
  0xfa   : > { %v641_v35 = vpop.f32.mrb[1].mxu0  ;;  %v665_v36 = vpop.f32.mrb[1].mxu1 }
  0xfb   : > { %v642_v37 = vadd.f32 %v641_v35, %v640_v32  ;;  %v666_v38 = vadd.f32 %v665_v36, %v664_v33  ;;  %v643_v39 = vpop.f32.mrb[2].mxu0  ;;  %v667_v40 = vpop.f32.mrb[2].mxu1 }
  0xfc   : > { %v644_v41 = vpop.f32.mrb[3].mxu0  ;;  %v668_v42 = vpop.f32.mrb[3].mxu1 }
  0xfd   : > { %v444_v43 = vadd.f32 %v642_v37, %v865_v34  ;;  %v476_v44 = vadd.f32 %v666_v38, %v865_v34  ;;  %v645_v45 = vadd.f32 %v644_v41, %v643_v39  ;;  %v669_v46 = vadd.f32 %v668_v42, %v667_v40 }
  0xff   : > { %506 = vst [vmem:[%s872_s30] sm:$0xff] %v444_v43  ;;  %514 = vst [vmem:[%s872_s30 + $0x40] sm:$0xff] %v476_v44  ;;  %v447_v47 = vadd.f32 %v645_v45, %v865_v34  ;;  %v479_v48 = vadd.f32 %v669_v46, %v865_v34 }
 0x101   : > { %507 = vst [vmem:[%s872_s30 + $0x8] sm:$0xff] %v447_v47  ;;  %515 = vst [vmem:[%s872_s30 + $0x48] sm:$0xff] %v479_v48  ;;  %v646_v49 = vpop.f32.mrb[4].mxu0  ;;  %v670_v50 = vpop.f32.mrb[4].mxu1 }
 0x102   : > { %v647_v51 = vpop.f32.mrb[5].mxu0  ;;  %v671_v52 = vpop.f32.mrb[5].mxu1 }
 0x103   : > { %v648_v53 = vadd.f32 %v647_v51, %v646_v49  ;;  %v672_v54 = vadd.f32 %v671_v52, %v670_v50  ;;  %v649_v55 = vpop.f32.mrb[6].mxu0  ;;  %v673_v56 = vpop.f32.mrb[6].mxu1 }
 0x104   : > { %v650_v57 = vpop.f32.mrb[7].mxu0  ;;  %v674_v58 = vpop.f32.mrb[7].mxu1 }
 0x105   : > { %v452_v59 = vadd.f32 %v648_v53, %v865_v34  ;;  %v484_v60 = vadd.f32 %v672_v54, %v865_v34  ;;  %v651_v61 = vadd.f32 %v650_v57, %v649_v55  ;;  %v675_v62 = vadd.f32 %v674_v58, %v673_v56 }
 0x107   : > { %508 = vst [vmem:[%s872_s30 + $0x10] sm:$0xff] %v452_v59  ;;  %516 = vst [vmem:[%s872_s30 + $0x50] sm:$0xff] %v484_v60  ;;  %v455_v63 = vadd.f32 %v651_v61, %v865_v34  ;;  %v487_v0 = vadd.f32 %v675_v62, %v865_v34 }
 0x109   : > { %509 = vst [vmem:[%s872_s30 + $0x18] sm:$0xff] %v455_v63  ;;  %517 = vst [vmem:[%s872_s30 + $0x58] sm:$0xff] %v487_v0  ;;  %v652_v1 = vpop.f32.mrb[8].mxu0  ;;  %v676_v2 = vpop.f32.mrb[8].mxu1 }
 0x10a   : > { %v653_v3 = vpop.f32.mrb[9].mxu0  ;;  %v677_v4 = vpop.f32.mrb[9].mxu1 }
 0x10b   : > { %v654_v5 = vadd.f32 %v653_v3, %v652_v1  ;;  %v678_v6 = vadd.f32 %v677_v4, %v676_v2  ;;  %v655_v7 = vpop.f32.mrb[10].mxu0  ;;  %v679_v8 = vpop.f32.mrb[10].mxu1 }
 0x10c   : > { %v656_v9 = vpop.f32.mrb[11].mxu0  ;;  %v680_v10 = vpop.f32.mrb[11].mxu1 }
 0x10d   : > { %v460_v11 = vadd.f32 %v654_v5, %v865_v34  ;;  %v492_v12 = vadd.f32 %v678_v6, %v865_v34  ;;  %v657_v13 = vadd.f32 %v656_v9, %v655_v7  ;;  %v681_v14 = vadd.f32 %v680_v10, %v679_v8 }
 0x10f   : > { %510 = vst [vmem:[%s872_s30 + $0x20] sm:$0xff] %v460_v11  ;;  %518 = vst [vmem:[%s872_s30 + $0x60] sm:$0xff] %v492_v12  ;;  %v463_v15 = vadd.f32 %v657_v13, %v865_v34  ;;  %v495_v16 = vadd.f32 %v681_v14, %v865_v34 }
 0x111   : > { %511 = vst [vmem:[%s872_s30 + $0x28] sm:$0xff] %v463_v15  ;;  %519 = vst [vmem:[%s872_s30 + $0x68] sm:$0xff] %v495_v16  ;;  %v658_v17 = vpop.f32.mrb[12].mxu0  ;;  %v682_v18 = vpop.f32.mrb[12].mxu1 }
 0x112   : > { %v659_v19 = vpop.f32.mrb[13].mxu0  ;;  %v683_v20 = vpop.f32.mrb[13].mxu1 }
 0x113   : > { %v660_v21 = vadd.f32 %v659_v19, %v658_v17  ;;  %v684_v22 = vadd.f32 %v683_v20, %v682_v18  ;;  %v661_v23 = vpop.f32.mrb[14].mxu0  ;;  %v685_v24 = vpop.f32.mrb[14].mxu1 }
 0x114   : > { %v662_v25 = vpop.f32.mrb[15].mxu0  ;;  %v686_v26 = vpop.f32.mrb[15].mxu1 }
 0x115   : > { %v468_v27 = vadd.f32 %v660_v21, %v865_v34  ;;  %v500_v28 = vadd.f32 %v684_v22, %v865_v34  ;;  %v663_v29 = vadd.f32 %v662_v25, %v661_v23  ;;  %v687_v30 = vadd.f32 %v686_v26, %v685_v24 }
 0x117   : > { %512 = vst [vmem:[%s872_s30 + $0x30] sm:$0xff] %v468_v27  ;;  %520 = vst [vmem:[%s872_s30 + $0x70] sm:$0xff] %v500_v28  ;;  %v471_v31 = vadd.f32 %v663_v29, %v865_v34  ;;  %v503_v32 = vadd.f32 %v687_v30, %v865_v34 }
 0x119   : > { %513 = vst [vmem:[%s872_s30 + $0x38] sm:$0xff] %v471_v31  ;;  %521 = vst [vmem:[%s872_s30 + $0x78] sm:$0xff] %v503_v32 }
 0x11a PF: > { %s13_s12 = sadd.s32 1, %s758_s12  }
 0x11b   : > { %p10_p4 = scmp.ge.s32.totalorder %s13_s12, 4  }
 0x11d   :  { %12 = sbr.rel (!%p10_p4) target bundleno = 1 (0x1), region = 62 }

// kernel: gcn_forward.4
= control target key start
LH: loop header
LB: loop body
LE: loop exit
PB: predicated region body
PF: predicated region fallthrough
CT: control target
= control target key end

     0   :  { %s726_s9 = smov 0   ;;  %s784_s0 = inlined_call_operand.vmem [shape: bf16[256,128], index: 0, kind: input, shape index: {}]   ;;  %s785_s1 = inlined_call_operand.vmem [shape: bf16[128,128], index: 1, kind: input, shape index: {}]   ;;  %s786_s2 = inlined_call_operand.vmem [shape: bf16[256,128], index: 2, kind: output, shape index: {}]  }
   0x1 LB: > { %s509_s10 = sadd.s32 4294967295, %s709_s9   ;;  %p513_p0 = scmp.ge.s32.totalorder %s709_s9, 1  ;;  %s709_s9 = sphi %s726_s9, %s12_s9  }
   0x2   : > { %p113_p1 = scmp.lt.s32.totalorder %s709_s9, 3 }
   0x4   : > { %p114_p2 = pnand %p513_p0, %p113_p1 }
   0x5   : > { %v687_v0 = vld [vmem:[%s785_s1] sm:$0xff] (!%p114_p2)   ;;  %s514_s13 = sshll.u32 (!%p114_p2), %s509_s10, 4  ;;  %v688_v1 = vld [vmem:[%s785_s1 + $0x8] sm:$0xff] (!%p114_p2)   ;;  %v689_v2 = vld [vmem:[%s785_s1 + $0x10] sm:$0xff] (!%p114_p2)  }
   0x6   : > { %117 = sbr.rel (%p114_p2) target bundleno = 264 (0x108), region = 28  ;;  %p136_p3 = scmp.lt.s32.totalorder (!%p114_p2), %s514_s13, 31  ;;  %631 = vmatprep.subr.bf16.mxu0 (!%p114_p2), %v687_v0  ;;  %663 = vmatprep.subr.bf16.mxu1 (!%p114_p2), %v687_v0  ;;  %v690_v3 = vld [vmem:[%s785_s1 + $0x18] sm:$0xff] (!%p114_p2)   ;;  %v691_v6 = vld [vmem:[%s785_s1 + $0x20] sm:$0xff] (!%p114_p2)   ;;  %v692_v7 = vld [vmem:[%s785_s1 + $0x28] sm:$0xff] (!%p114_p2)  }
   0x7   : > { %632 = vmatpush3.bf16.msra.mxu0 (!%p114_p2), %v687_v0  ;;  %671 = vmatpush3.bf16.msra.mxu1 (!%p114_p2), %v687_v0  ;;  %v693_v8 = vld [vmem:[%s785_s1 + $0x30] sm:$0xff] (!%p114_p2)   ;;  %v694_v9 = vld [vmem:[%s785_s1 + $0x38] sm:$0xff] (!%p114_p2)  }
   0x8   : > { %633 = vmatprep.subr.bf16.mxu0 (!%p114_p2), %v688_v1  ;;  %664 = vmatprep.subr.bf16.mxu1 (!%p114_p2), %v688_v1 }
   0xb   : > { %634 = vmatpush3.bf16.msra.mxu0 (!%p114_p2), %v688_v1  ;;  %672 = vmatpush3.bf16.msra.mxu1 (!%p114_p2), %v688_v1 }
   0xc   : > { %635 = vmatprep.subr.bf16.mxu0 (!%p114_p2), %v689_v2  ;;  %665 = vmatprep.subr.bf16.mxu1 (!%p114_p2), %v689_v2 }
   0xd   : > { %s788_s13 = smov (!%p136_p3, %s514_s13), 31 }
   0xe   : > { %s515_s18 = sshll.u32 %s788_s13, 2 }
   0xf   : > { %s751_s21 = scalar_lea.vmem %s784_s0, %s515_s18  ;;  %636 = vmatpush3.bf16.msra.mxu0 %v689_v2  ;;  %673 = vmatpush3.bf16.msra.mxu1 %v689_v2  ;;  %s145_s6 = scalar_lea.vmem %s786_s2, %s515_s18 }
  0x10   : > { %v695_v4 = vld [vmem:[%s751_s21] sm:$0xff]   ;;  %637 = vmatprep.subr.bf16.mxu0 %v690_v3  ;;  %666 = vmatprep.subr.bf16.mxu1 %v690_v3  ;;  %v697_v10 = vld [vmem:[%s751_s21 + $0x8] sm:$0xff]   ;;  %v699_v12 = vld [vmem:[%s751_s21 + $0x10] sm:$0xff]  }
  0x11   : > { %v696_v5 = vld [vmem:[%s751_s21 + $0x20] sm:$0xff]   ;;  %647 = vmatprep.mubr.bf16.mxu0 %v695_v4  ;;  %v698_v11 = vld [vmem:[%s751_s21 + $0x28] sm:$0xff]   ;;  %v700_v13 = vld [vmem:[%s751_s21 + $0x30] sm:$0xff]  }
  0x12   : > { %655 = vmatprep.mubr.bf16.mxu1 %v696_v5  ;;  %v701_v14 = vld [vmem:[%s751_s21 + $0x18] sm:$0xff]  }
  0x13   : > { %638 = vmatpush3.bf16.msra.mxu0 %v690_v3  ;;  %674 = vmatpush3.bf16.msra.mxu1 %v690_v3  ;;  %v702_v15 = vld [vmem:[%s751_s21 + $0x38] sm:$0xff]  }
  0x14   : > { %639 = vmatprep.subr.bf16.mxu0 %v691_v6  ;;  %667 = vmatprep.subr.bf16.mxu1 %v691_v6 }
  0x17   : > { %640 = vmatpush3.bf16.msra.mxu0 %v691_v6  ;;  %675 = vmatpush3.bf16.msra.mxu1 %v691_v6 }
  0x18   : > { %641 = vmatprep.subr.bf16.mxu0 %v692_v7  ;;  %668 = vmatprep.subr.bf16.mxu1 %v692_v7 }
  0x1b   : > { %642 = vmatpush3.bf16.msra.mxu0 %v692_v7  ;;  %676 = vmatpush3.bf16.msra.mxu1 %v692_v7 }
  0x1c   : > { %643 = vmatprep.subr.bf16.mxu0 %v693_v8  ;;  %669 = vmatprep.subr.bf16.mxu1 %v693_v8 }
  0x1f   : > { %644 = vmatpush3.bf16.msra.mxu0 %v693_v8  ;;  %677 = vmatpush3.bf16.msra.mxu1 %v693_v8 }
  0x20   : > { %645 = vmatprep.subr.bf16.mxu0 %v694_v9  ;;  %670 = vmatprep.subr.bf16.mxu1 %v694_v9 }
  0x23   : > { %646 = vmatpush3.bf16.msra.mxu0 %v694_v9  ;;  %678 = vmatpush3.bf16.msra.mxu1 %v694_v9 }
  0x26   : > { %648 = vmatmul.mubr.bf16.vlgmr.msra.gmra.mrb[0].mxu0 %v697_v10  ;;  %656 = vmatmul.mubr.bf16.vlgmr.msra.gmra.mrb[0].mxu1 %v698_v11 }
  0x27   : > { %651 = vmatprep.mubr.bf16.mxu0 %v699_v12  ;;  %659 = vmatprep.mubr.bf16.mxu1 %v700_v13 }
  0x2e   : > { %652 = vmatmul.mubr.bf16.gmra.mrb[4].mxu0 %v701_v14  ;;  %660 = vmatmul.mubr.bf16.gmra.mrb[4].mxu1 %v702_v15 }
  0xf9   : > { %v649_v16 = vpop.f32.mrb[0].mxu0  ;;  %v657_v17 = vpop.f32.mrb[0].mxu1 }
  0xfa   : > { %v310_v18 = vpop.f32.mrb[1].mxu0  ;;  %v342_v19 = vpop.f32.mrb[1].mxu1 }
  0xfb   : > { %v650_v20 = vpop.f32.mrb[2].mxu0  ;;  %v658_v21 = vpop.f32.mrb[2].mxu1 }
  0xfc   : > { %v576_v22 = vpack.c.bf16 %v650_v20, %v649_v16  ;;  %v596_v23 = vpack.c.bf16 %v658_v21, %v657_v17  ;;  %v313_v24 = vpop.f32.mrb[3].mxu0  ;;  %v345_v25 = vpop.f32.mrb[3].mxu1 }
  0xfd   : > { %v571_v26 = vpack.c.bf16 %v313_v24, %v310_v18  ;;  %v591_v27 = vpack.c.bf16 %v345_v25, %v342_v19 }
  0xfe   : > { %608 = vst [vmem:[%s145_s6 + $0x8] sm:$0xff] %v576_v22   ;;  %612 = vst [vmem:[%s145_s6 + $0x28] sm:$0xff] %v596_v23  }
  0xff   : > { %572 = vst [vmem:[%s145_s6] sm:$0xff] %v571_v26   ;;  %611 = vst [vmem:[%s145_s6 + $0x20] sm:$0xff] %v591_v27  }
 0x101   : > { %v653_v28 = vpop.f32.mrb[4].mxu0  ;;  %v661_v29 = vpop.f32.mrb[4].mxu1 }
 0x102   : > { %v326_v30 = vpop.f32.mrb[5].mxu0  ;;  %v358_v31 = vpop.f32.mrb[5].mxu1 }
 0x103   : > { %v654_v32 = vpop.f32.mrb[6].mxu0  ;;  %v662_v33 = vpop.f32.mrb[6].mxu1 }
 0x104   : > { %v586_v34 = vpack.c.bf16 %v654_v32, %v653_v28  ;;  %v606_v35 = vpack.c.bf16 %v662_v33, %v661_v29  ;;  %v329_v36 = vpop.f32.mrb[7].mxu0  ;;  %v361_v37 = vpop.f32.mrb[7].mxu1 }
 0x105   : > { %v581_v38 = vpack.c.bf16 %v329_v36, %v326_v30  ;;  %v601_v39 = vpack.c.bf16 %v361_v37, %v358_v31 }
 0x106   : > { %610 = vst [vmem:[%s145_s6 + $0x18] sm:$0xff] %v586_v34   ;;  %614 = vst [vmem:[%s145_s6 + $0x38] sm:$0xff] %v606_v35  }
 0x107   : > { %609 = vst [vmem:[%s145_s6 + $0x10] sm:$0xff] %v581_v38   ;;  %613 = vst [vmem:[%s145_s6 + $0x30] sm:$0xff] %v601_v39  }
 0x108 PF: > { %s12_s9 = sadd.s32 1, %s709_s9  }
 0x109   : > { %p9_p4 = scmp.ge.s32.totalorder %s12_s9, 4  }
 0x10b   :  { %11 = sbr.rel (!%p9_p4) target bundleno = 1 (0x1), region = 58 }

// kernel: gcn_forward.3
= control target key start
LH: loop header
LB: loop body
LE: loop exit
PB: predicated region body
PF: predicated region fallthrough
CT: control target
= control target key end

     0   :  { %s1188_s15 = smov 0   ;;  %s1312_s0 = inlined_call_operand.vmem [shape: bf16[256,256], index: 0, kind: input, shape index: {}]   ;;  %s1313_s1 = inlined_call_operand.vmem [shape: bf16[256,128], index: 1, kind: input, shape index: {}]   ;;  %s1314_s2 = inlined_call_operand.vmem [shape: bf16[128,128], index: 2, kind: input, shape index: {}]   ;;  %s1315_s3 = inlined_call_operand.vmem [shape: f32[1,128], index: 3, kind: input, shape index: {}]   ;;  %s1316_s4 = inlined_call_operand.vmem [shape: bf16[256,128], index: 4, kind: output, shape index: {}]  }
   0x1 LB: > { %s854_s16 = sadd.s32 4294967295, %s1161_s15   ;;  %p858_p0 = scmp.ge.s32.totalorder %s1161_s15, 1  ;;  %s1161_s15 = sphi %s1188_s15, %s14_s15  }
   0x2   : > { %p164_p1 = scmp.lt.s32.totalorder %s1161_s15, 3 }
   0x4   : > { %p165_p2 = pnand %p858_p0, %p164_p1 }
   0x5   : > { %v1107_v0 = vld [vmem:[%s1313_s1 + $0x40] sm:$0xff] (!%p165_p2)   ;;  %s859_s19 = sshll.u32 (!%p165_p2), %s854_s16, 4  ;;  %v1109_v2 = vld [vmem:[%s1313_s1 + $0x48] sm:$0xff] (!%p165_p2)   ;;  %v1111_v4 = vld [vmem:[%s1313_s1 + $0x50] sm:$0xff] (!%p165_p2)  }
   0x6   : > { %168 = sbr.rel (%p165_p2) target bundleno = 535 (0x217), region = 36  ;;  %v1108_v1 = vld [vmem:[%s1313_s1] sm:$0xff] (!%p165_p2)   ;;  %987 = vmatprep.subr.bf16.mxu0 (!%p165_p2), %v1107_v0  ;;  %v1110_v3 = vld [vmem:[%s1313_s1 + $0x8] sm:$0xff] (!%p165_p2)   ;;  %p192_p3 = scmp.lt.s32.totalorder (!%p165_p2), %s859_s19, 31  ;;  %v1112_v5 = vld [vmem:[%s1313_s1 + $0x10] sm:$0xff] (!%p165_p2)  }
   0x7   : > { %988 = vmatpush3.bf16.msra.mxu0 (!%p165_p2), %v1108_v1  ;;  %v1113_v6 = vld [vmem:[%s1313_s1 + $0x58] sm:$0xff] (!%p165_p2)   ;;  %v1115_v8 = vld [vmem:[%s1313_s1 + $0x60] sm:$0xff] (!%p165_p2)   ;;  %v1117_v10 = vld [vmem:[%s1313_s1 + $0x68] sm:$0xff] (!%p165_p2)  }
   0x8   : > { %989 = vmatprep.subr.bf16.mxu0 (!%p165_p2), %v1109_v2  ;;  %v1114_v7 = vld [vmem:[%s1313_s1 + $0x18] sm:$0xff] (!%p165_p2)   ;;  %v1116_v9 = vld [vmem:[%s1313_s1 + $0x20] sm:$0xff] (!%p165_p2)   ;;  %v1118_v12 = vld [vmem:[%s1313_s1 + $0x28] sm:$0xff] (!%p165_p2)  }
   0x9   : > { %v1119_v13 = vld [vmem:[%s1313_s1 + $0x70] sm:$0xff] (!%p165_p2)   ;;  %v1121_v15 = vld [vmem:[%s1313_s1 + $0x78] sm:$0xff] (!%p165_p2)   ;;  %v1147_v17 = vld [vmem:[%s1314_s2] sm:$0xff] (!%p165_p2)  }
   0xa   : > { %v1120_v14 = vld [vmem:[%s1313_s1 + $0x30] sm:$0xff] (!%p165_p2)   ;;  %v1122_v16 = vld [vmem:[%s1313_s1 + $0x38] sm:$0xff] (!%p165_p2)   ;;  %v1148_v19 = vld [vmem:[%s1314_s2 + $0x8] sm:$0xff] (!%p165_p2)   ;;  %1067 = vmatprep.subr.bf16.mxu1 (!%p165_p2), %v1147_v17 }
   0xb   : > { %990 = vmatpush3.bf16.msra.mxu0 (!%p165_p2), %v1110_v3  ;;  %1068 = vmatpush3.bf16.msra.mxu1 (!%p165_p2), %v1147_v17  ;;  %v1149_v21 = vld [vmem:[%s1314_s2 + $0x10] sm:$0xff] (!%p165_p2)   ;;  %v1150_v22 = vld [vmem:[%s1314_s2 + $0x18] sm:$0xff] (!%p165_p2)   ;;  %v1151_v36 = vld [vmem:[%s1314_s2 + $0x20] sm:$0xff] (!%p165_p2)  }
   0xc   : > { %991 = vmatprep.subr.bf16.mxu0 (!%p165_p2), %v1111_v4  ;;  %1069 = vmatprep.subr.bf16.mxu1 (!%p165_p2), %v1148_v19  ;;  %v1152_v37 = vld [vmem:[%s1314_s2 + $0x28] sm:$0xff] (!%p165_p2)   ;;  %v1153_v38 = vld [vmem:[%s1314_s2 + $0x30] sm:$0xff] (!%p165_p2)   ;;  %v1154_v39 = vld [vmem:[%s1314_s2 + $0x38] sm:$0xff] (!%p165_p2)  }
   0xd   : > { %s1318_s19 = smov (!%p192_p3, %s859_s19), 31 }
   0xe   : > { %s923_s8 = sshll.u32 %s1318_s19, 3  ;;  %s863_s24 = sshll.u32 %s1318_s19, 2 }
   0xf   : > { %992 = vmatpush3.bf16.msra.mxu0 %v1112_v5  ;;  %s1229_s13 = scalar_lea.vmem %s1312_s0, %s923_s8  ;;  %1070 = vmatpush3.bf16.msra.mxu1 %v1148_v19  ;;  %s1299_s27 = scalar_lea.vmem %s1316_s4, %s863_s24 }
  0x10   : > { %993 = vmatprep.subr.bf16.mxu0 %v1113_v6  ;;  %v1125_v11 = vld [vmem:[%s1229_s13 + $0x4] ss:$8 sps:$4 sm:$0xff]   ;;  %v1123_v18 = vld [vmem:[%s1229_s13] ss:$8 sps:$4 sm:$0xff]   ;;  %v1126_v20 = vld [vmem:[%s1229_s13 + $0x14] ss:$8 sps:$4 sm:$0xff]   ;;  %1071 = vmatprep.subr.bf16.mxu1 %v1149_v21 }
  0x11   : > { %461 = vmatprep.mubr.bf16.mxu0 %v1125_v11  ;;  %v1128_v23 = vld [vmem:[%s1229_s13 + $0x10] ss:$8 sps:$4 sm:$0xff]   ;;  %v1129_v24 = vld [vmem:[%s1229_s13 + $0x24] ss:$8 sps:$4 sm:$0xff]   ;;  %v1131_v25 = vld [vmem:[%s1229_s13 + $0x20] ss:$8 sps:$4 sm:$0xff]  }
  0x12   : > { %v1132_v26 = vld [vmem:[%s1229_s13 + $0x34] ss:$8 sps:$4 sm:$0xff]   ;;  %v1134_v27 = vld [vmem:[%s1229_s13 + $0x30] ss:$8 sps:$4 sm:$0xff]   ;;  %v1135_v28 = vld [vmem:[%s1229_s13 + $0x44] ss:$8 sps:$4 sm:$0xff]  }
  0x13   : > { %994 = vmatpush3.bf16.msra.mxu0 %v1114_v7  ;;  %1072 = vmatpush3.bf16.msra.mxu1 %v1149_v21  ;;  %v1137_v29 = vld [vmem:[%s1229_s13 + $0x40] ss:$8 sps:$4 sm:$0xff]   ;;  %v1138_v30 = vld [vmem:[%s1229_s13 + $0x54] ss:$8 sps:$4 sm:$0xff]   ;;  %v1140_v31 = vld [vmem:[%s1229_s13 + $0x50] ss:$8 sps:$4 sm:$0xff]  }
  0x14   : > { %995 = vmatprep.subr.bf16.mxu0 %v1115_v8  ;;  %1073 = vmatprep.subr.bf16.mxu1 %v1150_v22  ;;  %v1141_v32 = vld [vmem:[%s1229_s13 + $0x64] ss:$8 sps:$4 sm:$0xff]   ;;  %v1143_v33 = vld [vmem:[%s1229_s13 + $0x60] ss:$8 sps:$4 sm:$0xff]   ;;  %v1144_v34 = vld [vmem:[%s1229_s13 + $0x74] ss:$8 sps:$4 sm:$0xff]  }
  0x15   : > { %v1146_v35 = vld [vmem:[%s1229_s13 + $0x70] ss:$8 sps:$4 sm:$0xff]  }
  0x17   : > { %996 = vmatpush3.bf16.msra.mxu0 %v1116_v9  ;;  %1074 = vmatpush3.bf16.msra.mxu1 %v1150_v22 }
  0x18   : > { %997 = vmatprep.subr.bf16.mxu0 %v1117_v10  ;;  %1075 = vmatprep.subr.bf16.mxu1 %v1151_v36 }
  0x1b   : > { %998 = vmatpush3.bf16.msra.mxu0 %v1118_v12  ;;  %1076 = vmatpush3.bf16.msra.mxu1 %v1151_v36 }
  0x1c   : > { %999 = vmatprep.subr.bf16.mxu0 %v1119_v13  ;;  %1077 = vmatprep.subr.bf16.mxu1 %v1152_v37 }
  0x1f   : > { %1000 = vmatpush3.bf16.msra.mxu0 %v1120_v14  ;;  %1078 = vmatpush3.bf16.msra.mxu1 %v1152_v37 }
  0x20   : > { %1001 = vmatprep.subr.bf16.mxu0 %v1121_v15  ;;  %1079 = vmatprep.subr.bf16.mxu1 %v1153_v38 }
  0x23   : > { %1002 = vmatpush3.bf16.msra.mxu0 %v1122_v16  ;;  %1080 = vmatpush3.bf16.msra.mxu1 %v1153_v38 }
  0x24   : > { %1081 = vmatprep.subr.bf16.mxu1 %v1154_v39 }
  0x26   : > { %462 = vmatmul.mubr.bf16.vlgmr.msra.gmra.mrb[0].mxu0 %v1123_v18 }
  0x27   : > { %469 = vmatprep.mubr.bf16.mxu0 %v1126_v20  ;;  %1082 = vmatpush3.bf16.msra.mxu1 %v1154_v39 }
  0x2e   : > { %470 = vmatmul.mubr.bf16.gmra.mrb[4].mxu0 %v1128_v23 }
  0x2f   : > { %477 = vmatprep.mubr.bf16.mxu0 %v1129_v24 }
  0x36   : > { %478 = vmatmul.mubr.bf16.gmra.mrb[8].mxu0 %v1131_v25 }
  0x37   : > { %485 = vmatprep.mubr.bf16.mxu0 %v1132_v26 }
  0x3e   : > { %486 = vmatmul.mubr.bf16.gmra.mrb[12].mxu0 %v1134_v27 }
  0x3f   : > { %493 = vmatprep.mubr.bf16.mxu0 %v1135_v28 }
  0x46   : > { %494 = vmatmul.mubr.bf16.gmra.mrb[16].mxu0 %v1137_v29 }
  0x47   : > { %501 = vmatprep.mubr.bf16.mxu0 %v1138_v30 }
  0x4e   : > { %502 = vmatmul.mubr.bf16.gmra.mrb[20].mxu0 %v1140_v31 }
  0x4f   : > { %509 = vmatprep.mubr.bf16.mxu0 %v1141_v32  ;;  %v896_v32 = vld [vmem:[%s1315_s3] ss:$0 sm:$0xff] }
  0x56   : > { %510 = vmatmul.mubr.bf16.gmra.mrb[24].mxu0 %v1143_v33 }
  0x57   : > { %517 = vmatprep.mubr.bf16.mxu0 %v1144_v34 }
  0x5e   : > { %518 = vmatmul.mubr.bf16.gmra.mrb[28].mxu0 %v1146_v35 }
  0xf9   : > { %v1003_v40 = vpop.f32.mrb[0].mxu0 }
  0xfa   : > { %v1004_v41 = vpop.f32.mrb[1].mxu0 }
  0xfb   : > { %v1005_v42 = vadd.f32 %v1004_v41, %v1003_v40  ;;  %v1006_v43 = vpop.f32.mrb[2].mxu0 }
  0xfc   : > { %v1007_v44 = vpop.f32.mrb[3].mxu0 }
  0xfd   : > { %v1008_v45 = vadd.f32 %v1007_v44, %v1006_v43 }
  0xff   : > { %v526_v46 = vpack.c.bf16 %v1008_v45, %v1005_v42 }
 0x101   : > { %v1009_v47 = vpop.f32.mrb[4].mxu0  ;;  %1083 = vmatprep.mubr.bf16.mxu1 %v526_v46 }
 0x102   : > { %v1010_v48 = vpop.f32.mrb[5].mxu0 }
 0x103   : > { %v1011_v49 = vadd.f32 %v1010_v48, %v1009_v47  ;;  %v1012_v50 = vpop.f32.mrb[6].mxu0 }
 0x104   : > { %v1013_v51 = vpop.f32.mrb[7].mxu0 }
 0x105   : > { %v1014_v52 = vadd.f32 %v1013_v51, %v1012_v50 }
 0x107   : > { %v527_v53 = vpack.c.bf16 %v1014_v52, %v1011_v49 }
 0x109   : > { %v1015_v54 = vpop.f32.mrb[8].mxu0  ;;  %1084 = vmatmul.mubr.bf16.vlgmr.msra.gmra.mrb[0].mxu1 %v527_v53 }
 0x10a   : > { %v1016_v55 = vpop.f32.mrb[9].mxu0 }
 0x10b   : > { %v1017_v56 = vadd.f32 %v1016_v55, %v1015_v54  ;;  %v1018_v57 = vpop.f32.mrb[10].mxu0 }
 0x10c   : > { %v1019_v58 = vpop.f32.mrb[11].mxu0 }
 0x10d   : > { %v1020_v59 = vadd.f32 %v1019_v58, %v1018_v57 }
 0x10f   : > { %v528_v60 = vpack.c.bf16 %v1020_v59, %v1017_v56 }
 0x111   : > { %v1021_v61 = vpop.f32.mrb[12].mxu0  ;;  %1087 = vmatprep.mubr.bf16.mxu1 %v528_v60 }
 0x112   : > { %v1022_v62 = vpop.f32.mrb[13].mxu0 }
 0x113   : > { %v1023_v63 = vadd.f32 %v1022_v62, %v1021_v61  ;;  %v1024_v0 = vpop.f32.mrb[14].mxu0 }
 0x114   : > { %v1025_v1 = vpop.f32.mrb[15].mxu0 }
 0x115   : > { %v1026_v2 = vadd.f32 %v1025_v1, %v1024_v0 }
 0x117   : > { %v529_v3 = vpack.c.bf16 %v1026_v2, %v1023_v63 }
 0x119   : > { %v1027_v4 = vpop.f32.mrb[16].mxu0  ;;  %1088 = vmatmul.mubr.bf16.gmra.mrb[4].mxu1 %v529_v3 }
 0x11a   : > { %v1028_v5 = vpop.f32.mrb[17].mxu0 }
 0x11b   : > { %v1029_v6 = vadd.f32 %v1028_v5, %v1027_v4  ;;  %v1030_v7 = vpop.f32.mrb[18].mxu0 }
 0x11c   : > { %v1031_v8 = vpop.f32.mrb[19].mxu0 }
 0x11d   : > { %v1032_v9 = vadd.f32 %v1031_v8, %v1030_v7 }
 0x11f   : > { %v530_v10 = vpack.c.bf16 %v1032_v9, %v1029_v6 }
 0x121   : > { %v1033_v11 = vpop.f32.mrb[20].mxu0  ;;  %1091 = vmatprep.mubr.bf16.mxu1 %v530_v10 }
 0x122   : > { %v1034_v12 = vpop.f32.mrb[21].mxu0 }
 0x123   : > { %v1035_v13 = vadd.f32 %v1034_v12, %v1033_v11  ;;  %v1036_v14 = vpop.f32.mrb[22].mxu0 }
 0x124   : > { %v1037_v15 = vpop.f32.mrb[23].mxu0 }
 0x125   : > { %v1038_v16 = vadd.f32 %v1037_v15, %v1036_v14 }
 0x127   : > { %v531_v17 = vpack.c.bf16 %v1038_v16, %v1035_v13 }
 0x129   : > { %v1039_v18 = vpop.f32.mrb[24].mxu0  ;;  %1092 = vmatmul.mubr.bf16.gmra.mrb[8].mxu1 %v531_v17 }
 0x12a   : > { %v1040_v19 = vpop.f32.mrb[25].mxu0 }
 0x12b   : > { %v1041_v20 = vadd.f32 %v1040_v19, %v1039_v18  ;;  %v1042_v21 = vpop.f32.mrb[26].mxu0 }
 0x12c   : > { %v1043_v22 = vpop.f32.mrb[27].mxu0 }
 0x12d   : > { %v1044_v23 = vadd.f32 %v1043_v22, %v1042_v21 }
 0x12f   : > { %v532_v24 = vpack.c.bf16 %v1044_v23, %v1041_v20 }
 0x131   : > { %v1045_v25 = vpop.f32.mrb[28].mxu0  ;;  %1095 = vmatprep.mubr.bf16.mxu1 %v532_v24 }
 0x132   : > { %v1046_v26 = vpop.f32.mrb[29].mxu0 }
 0x133   : > { %v1047_v27 = vadd.f32 %v1046_v26, %v1045_v25  ;;  %v1048_v28 = vpop.f32.mrb[30].mxu0 }
 0x134   : > { %v1049_v29 = vpop.f32.mrb[31].mxu0 }
 0x135   : > { %v1050_v30 = vadd.f32 %v1049_v29, %v1048_v28 }
 0x137   : > { %v533_v31 = vpack.c.bf16 %v1050_v30, %v1047_v27 }
 0x139   : > { %1096 = vmatmul.mubr.bf16.gmra.mrb[12].mxu1 %v533_v31 }
 0x1dc   : > { %v1085_v33 = vpop.f32.mrb[0].mxu1 }
 0x1dd   : > { %v648_v34 = vadd.f32 %v1085_v33, %v896_v32  ;;  %v639_v35 = vpop.f32.mrb[1].mxu1 }
 0x1de   : > { %v640_v36 = vadd.f32 %v896_v32, %v639_v35  ;;  %v1086_v37 = vpop.f32.mrb[2].mxu1 }
 0x1df   : > { %v651_v38 = vadd.f32 %v1086_v37, %v896_v32  ;;  %v642_v39 = vpop.f32.mrb[3].mxu1  ;;  %v704_v41 = vmax.f32 %v648_v34, 0.0 }
 0x1e0   : > { %v643_v40 = vadd.f32 %v896_v32, %v642_v39  ;;  %v702_v43 = vmax.f32 %v640_v36, 0.0 }
 0x1e1   : > { %v705_v42 = vmax.f32 %v651_v38, 0.0 }
 0x1e2   : > { %v703_v44 = vmax.f32 %v643_v40, 0.0 }
 0x1e3   : > { %v948_v45 = vpack.c.bf16 %v705_v42, %v704_v41 }
 0x1e4   : > { %v943_v46 = vpack.c.bf16 %v703_v44, %v702_v43 }
 0x1e5   : > { %980 = vst [vmem:[%s1299_s27 + $0x8] sm:$0xff] %v948_v45  }
 0x1e6   : > { %944 = vst [vmem:[%s1299_s27] sm:$0xff] %v943_v46  }
 0x1ec   : > { %v1089_v47 = vpop.f32.mrb[4].mxu1 }
 0x1ed   : > { %v664_v48 = vadd.f32 %v1089_v47, %v896_v32  ;;  %v655_v49 = vpop.f32.mrb[5].mxu1 }
 0x1ee   : > { %v656_v50 = vadd.f32 %v896_v32, %v655_v49  ;;  %v1090_v51 = vpop.f32.mrb[6].mxu1 }
 0x1ef   : > { %v667_v52 = vadd.f32 %v1090_v51, %v896_v32  ;;  %v658_v53 = vpop.f32.mrb[7].mxu1  ;;  %v708_v55 = vmax.f32 %v664_v48, 0.0 }
 0x1f0   : > { %v659_v54 = vadd.f32 %v896_v32, %v658_v53  ;;  %v706_v57 = vmax.f32 %v656_v50, 0.0 }
 0x1f1   : > { %v709_v56 = vmax.f32 %v667_v52, 0.0 }
 0x1f2   : > { %v707_v58 = vmax.f32 %v659_v54, 0.0 }
 0x1f3   : > { %v958_v59 = vpack.c.bf16 %v709_v56, %v708_v55 }
 0x1f4   : > { %v953_v60 = vpack.c.bf16 %v707_v58, %v706_v57 }
 0x1f5   : > { %982 = vst [vmem:[%s1299_s27 + $0x18] sm:$0xff] %v958_v59  }
 0x1f6   : > { %981 = vst [vmem:[%s1299_s27 + $0x10] sm:$0xff] %v953_v60  }
 0x1fc   : > { %v1093_v61 = vpop.f32.mrb[8].mxu1 }
 0x1fd   : > { %v680_v62 = vadd.f32 %v1093_v61, %v896_v32  ;;  %v671_v63 = vpop.f32.mrb[9].mxu1 }
 0x1fe   : > { %v672_v0 = vadd.f32 %v896_v32, %v671_v63  ;;  %v1094_v1 = vpop.f32.mrb[10].mxu1 }
 0x1ff   : > { %v683_v2 = vadd.f32 %v1094_v1, %v896_v32  ;;  %v674_v3 = vpop.f32.mrb[11].mxu1  ;;  %v712_v5 = vmax.f32 %v680_v62, 0.0 }
 0x200   : > { %v675_v4 = vadd.f32 %v896_v32, %v674_v3  ;;  %v710_v7 = vmax.f32 %v672_v0, 0.0 }
 0x201   : > { %v713_v6 = vmax.f32 %v683_v2, 0.0 }
 0x202   : > { %v711_v8 = vmax.f32 %v675_v4, 0.0 }
 0x203   : > { %v968_v9 = vpack.c.bf16 %v713_v6, %v712_v5 }
 0x204   : > { %v963_v10 = vpack.c.bf16 %v711_v8, %v710_v7 }
 0x205   : > { %984 = vst [vmem:[%s1299_s27 + $0x28] sm:$0xff] %v968_v9  }
 0x206   : > { %983 = vst [vmem:[%s1299_s27 + $0x20] sm:$0xff] %v963_v10  }
 0x20c   : > { %v1097_v11 = vpop.f32.mrb[12].mxu1 }
 0x20d   : > { %v696_v12 = vadd.f32 %v1097_v11, %v896_v32  ;;  %v687_v13 = vpop.f32.mrb[13].mxu1 }
 0x20e   : > { %v688_v14 = vadd.f32 %v896_v32, %v687_v13  ;;  %v1098_v15 = vpop.f32.mrb[14].mxu1 }
 0x20f   : > { %v699_v16 = vadd.f32 %v1098_v15, %v896_v32  ;;  %v690_v17 = vpop.f32.mrb[15].mxu1  ;;  %v716_v19 = vmax.f32 %v696_v12, 0.0 }
 0x210   : > { %v691_v18 = vadd.f32 %v896_v32, %v690_v17  ;;  %v714_v21 = vmax.f32 %v688_v14, 0.0 }
 0x211   : > { %v717_v20 = vmax.f32 %v699_v16, 0.0 }
 0x212   : > { %v715_v22 = vmax.f32 %v691_v18, 0.0 }
 0x213   : > { %v978_v23 = vpack.c.bf16 %v717_v20, %v716_v19 }
 0x214   : > { %v973_v24 = vpack.c.bf16 %v715_v22, %v714_v21 }
 0x215   : > { %986 = vst [vmem:[%s1299_s27 + $0x38] sm:$0xff] %v978_v23  }
 0x216   : > { %985 = vst [vmem:[%s1299_s27 + $0x30] sm:$0xff] %v973_v24  }
 0x217 PF: > { %s14_s15 = sadd.s32 1, %s1161_s15  }
 0x218   : > { %p11_p4 = scmp.ge.s32.totalorder %s14_s15, 4  }
 0x21a   :  { %13 = sbr.rel (!%p11_p4) target bundleno = 1 (0x1), region = 66 }

</bundles_post_ra>
